<compile_context>
chip_gen: v6e
topology: v6e:2x2x1
jax: 0.10.0
libtpu: 0.0.40
codegen_flags: <defaults>
</compile_context>

<pallas_src>
import functools

import jax
import jax.numpy as jnp
from jax.experimental import pallas as pl
from jax.experimental.pallas import tpu as pltpu

LANE = 128  # TPU lane width; hidden feature dims are padded to multiples of this.


def _round_up(x, m):
    return ((x + m - 1) // m) * m


def _pad2(a, rows, cols):
    r, c = a.shape
    return jnp.pad(a, ((0, rows - r), (0, cols - c)))


def _choose_tile(batch, block_batch):
    """Pick the per-grid-step batch tile (multiple of 8)."""
    b8 = _round_up(max(batch, 1), 8)
    tb = min(block_batch, b8)
    # v7x has 2 TensorCores: with enough work, prefer >=2 grid tiles so the
    # "parallel" batch axis can actually be split across cores.
    if tb == b8 and b8 >= 256:
        tb = _round_up((b8 + 1) // 2, 8)
    return tb


def _actor_kernel(x_ref, w1_ref, b1_ref, w2_ref, b2_ref, w3_ref, b3_ref, o_ref):
    # One batch tile per grid step; weights/biases are VMEM-resident (their
    # index_map always returns block (0, 0)).  f32 accumulation throughout.
    x = x_ref[...]
    h1 = jnp.dot(x, w1_ref[...], preferred_element_type=jnp.float32) + b1_ref[...]
    h1 = jnp.maximum(h1, 0.0)
    h2 = jnp.dot(h1, w2_ref[...], preferred_element_type=jnp.float32) + b2_ref[...]
    h2 = jnp.maximum(h2, 0.0)
    mu = jnp.dot(h2, w3_ref[...], preferred_element_type=jnp.float32) + b3_ref[...]
    o_ref[...] = jnp.tanh(mu).astype(o_ref.dtype)


def prepare_actor_params(w1, b1, w2, b2, w3, b3):
    """Pad the parameters once (call at init, not per forward step).

    Hidden dims (fc1, fc2) are lane-padded to 128; the input dim and the
    action dim are left unpadded (narrow input stream / narrow output store).
    """
    in_dim, f1 = w1.shape
    f2 = w2.shape[1]
    na = w3.shape[1]
    f1_p = _round_up(f1, LANE)
    f2_p = _round_up(f2, LANE)

    w1p = _pad2(w1.astype(jnp.float32), in_dim, f1_p)
    b1p = _pad2(b1.astype(jnp.float32), 1, f1_p)
    w2p = _pad2(w2.astype(jnp.float32), f1_p, f2_p)
    b2p = _pad2(b2.astype(jnp.float32), 1, f2_p)
    w3p = _pad2(w3.astype(jnp.float32), f2_p, na)
    b3p = b3.astype(jnp.float32)
    return w1p, b1p, w2p, b2p, w3p, b3p


@functools.partial(jax.jit, static_argnames=("block_batch",))
def actor_forward(state, w1p, b1p, w2p, b2p, w3p, b3p, *, block_batch=512):
    """Pallas forward pass of the TD3 ActorNetwork.

    Args:
      state: [batch, input_dim] f32 (input_dim left unpadded).
      w1p/b1p, w2p/b2p, w3p/b3p: pre-padded params from prepare_actor_params.
      block_batch: max batch-tile size (rows per grid step), multiple of 8.
    Returns:
      mu: [batch, n_actions] f32 in (-1, 1)
    """
    if block_batch <= 0 or block_batch % 8 != 0:
        raise ValueError(f"block_batch must be a positive multiple of 8, got {block_batch}")

    batch, in_dim = state.shape
    assert w1p.shape[0] == in_dim, "state feature dim must match w1"
    f1_p = w1p.shape[1]
    f2_p = w2p.shape[1]
    na = w3p.shape[1]

    tb = _choose_tile(batch, block_batch)
    b_p = _round_up(batch, tb)
    grid = (b_p // tb,)

    # Only the batch axis is padded (rows of zeros); padded rows are sliced
    # off at the end, so their (nonzero) outputs never escape.
    xp = _pad2(state.astype(jnp.float32), b_p, in_dim)

    # Advisory cost: padded work actually executed by the kernel.
    flops = 2 * b_p * (in_dim * f1_p + f1_p * f2_p + f2_p * na)
    bytes_accessed = 4 * (
        b_p * in_dim
        + in_dim * f1_p + f1_p
        + f1_p * f2_p + f2_p
        + f2_p * na + na
        + b_p * na
    )
    cost = pl.CostEstimate(
        flops=flops, transcendentals=b_p * na, bytes_accessed=bytes_accessed
    )

    # Weights/biases: same block every grid step -> loaded once, stay in VMEM.
    resident = lambda shape: pl.BlockSpec(shape, lambda i: (0, 0))

    out = pl.pallas_call(
        _actor_kernel,
        out_shape=jax.ShapeDtypeStruct((b_p, na), jnp.float32),
        grid=grid,
        in_specs=[
            pl.BlockSpec((tb, in_dim), lambda i: (i, 0)),  # state tile (narrow)
            resident((in_dim, f1_p)), resident((1, f1_p)),
            resident((f1_p, f2_p)), resident((1, f2_p)),
            resident((f2_p, na)), resident((1, na)),
        ],
        out_specs=pl.BlockSpec((tb, na), lambda i: (i, 0)),  # narrow output store
        compiler_params=pltpu.CompilerParams(
            dimension_semantics=("parallel",),       # megacore split on v7x
            vmem_limit_bytes=32 * 1024 * 1024,       # safe on v7x's 64 MiB VMEM
        ),
        cost_estimate=cost,
    )(xp, w1p, b1p, w2p, b2p, w3p, b3p)

    return out[:batch, :]


@jax.jit
def reference_forward(state, w1, b1, w2, b2, w3, b3):
    h1 = jnp.maximum(state @ w1 + b1, 0.0)
    h2 = jnp.maximum(h1 @ w2 + b2, 0.0)
    return jnp.tanh(h2 @ w3 + b3)


def actor_forward_auto(state, raw_params, padded_params, *,
                       block_batch=512, min_pallas_batch=64):
    """Explicit crossover: below ~1 tile of work, a plain jitted XLA MLP is
    at least as fast as paying Pallas launch + resident-weight DMA cost."""
    if state.shape[0] < min_pallas_batch:
        return reference_forward(state, *raw_params)
    return actor_forward(state, *padded_params, block_batch=block_batch)


def init_linear_params(key, fan_in, fan_out):
    """nn.Linear-style init U(-1/sqrt(fan_in), 1/sqrt(fan_in)).

    Weight returned transposed to [fan_in, fan_out]; bias is [1, fan_out]."""
    kw, kb = jax.random.split(key)
    bound = 1.0 / jnp.sqrt(jnp.float32(fan_in))
    w = jax.random.uniform(kw, (fan_in, fan_out), jnp.float32, -bound, bound)
    b = jax.random.uniform(kb, (1, fan_out), jnp.float32, -bound, bound)
    return w, b


if __name__ == "__main__":
    # Shapes consistent with ActorNetwork(alpha, input_dims=[8], fc1_dims=32,
    # fc2_dims=32, n_actions=4, ...).
    batch = 2
    input_dim = 8
    fc1_dims = 32
    fc2_dims = 32
    n_actions = 4

    key = jax.random.PRNGKey(0)
    k_state, k1, k2, k3 = jax.random.split(key, 4)

    state = jax.random.normal(k_state, (batch, input_dim), jnp.float32)
    w1, b1 = init_linear_params(k1, input_dim, fc1_dims)
    w2, b2 = init_linear_params(k2, fc1_dims, fc2_dims)
    w3, b3 = init_linear_params(k3, fc2_dims, n_actions)

    raw_params = (w1, b1, w2, b2, w3, b3)
    padded_params = prepare_actor_params(*raw_params)

    # Small-batch path: still run the Pallas kernel (single small tile).
    mu = actor_forward(state, *padded_params, block_batch=512)
    jax.block_until_ready(mu)

    ref = reference_forward(state, *raw_params)
    assert mu.shape == (batch, n_actions)
    assert jnp.allclose(mu, ref, atol=1e-5, rtol=1e-5), "mismatch vs reference"

    # Larger batch exercising >1 grid step (megacore-splittable on v7x).
    big_batch = 1000
    big_state = jax.random.normal(k_state, (big_batch, input_dim), jnp.float32)
    mu_big = actor_forward(big_state, *padded_params, block_batch=512)
    jax.block_until_ready(mu_big)
    ref_big = reference_forward(big_state, *raw_params)
    assert mu_big.shape == (big_batch, n_actions)
    assert jnp.allclose(mu_big, ref_big, atol=1e-5, rtol=1e-5), "big-batch mismatch"

    # Auto-dispatch helper (XLA fallback for tiny batches) also stays correct.
    mu_auto = actor_forward_auto(state, raw_params, padded_params)
    jax.block_until_ready(mu_auto)
    assert jnp.allclose(mu_auto, ref, atol=1e-5, rtol=1e-5), "auto-path mismatch"

    print("KERNEL_OK")
</pallas_src>

<mosaic_0001>
module attributes {stable_mosaic.version = 11 : i64} {
  func.func @_actor_kernel(%arg0: i32, %arg1: memref<8x8xf32, #tpu.memory_space<vmem>>, %arg2: memref<8x128xf32, #tpu.memory_space<vmem>>, %arg3: memref<1x128xf32, #tpu.memory_space<vmem>>, %arg4: memref<128x128xf32, #tpu.memory_space<vmem>>, %arg5: memref<1x128xf32, #tpu.memory_space<vmem>>, %arg6: memref<128x4xf32, #tpu.memory_space<vmem>>, %arg7: memref<1x4xf32, #tpu.memory_space<vmem>>, %arg8: memref<8x4xf32, #tpu.memory_space<vmem>>) attributes {dimension_semantics = [#tpu.dimension_semantics<parallel>], iteration_bounds = array<i64: 1>, scalar_prefetch = 0 : i64, scratch_operands = 0 : i64, tpu.core_type = #tpu.core_type<tc>, window_params = [{transform_indices = @transform_0, window_bounds = array<i64: 8, 8>}, {pipeline_mode = #tpu.pipeline_mode<synchronous>, transform_indices = @transform_1, window_bounds = array<i64: 8, 128>}, {pipeline_mode = #tpu.pipeline_mode<synchronous>, transform_indices = @transform_2, window_bounds = array<i64: 1, 128>}, {pipeline_mode = #tpu.pipeline_mode<synchronous>, transform_indices = @transform_3, window_bounds = array<i64: 128, 128>}, {pipeline_mode = #tpu.pipeline_mode<synchronous>, transform_indices = @transform_4, window_bounds = array<i64: 1, 128>}, {pipeline_mode = #tpu.pipeline_mode<synchronous>, transform_indices = @transform_5, window_bounds = array<i64: 128, 4>}, {pipeline_mode = #tpu.pipeline_mode<synchronous>, transform_indices = @transform_6, window_bounds = array<i64: 1, 4>}, {transform_indices = @transform_7, window_bounds = array<i64: 8, 4>}]} {
    %c0 = arith.constant 0 : index
    %c0_0 = arith.constant 0 : index
    %0 = vector.load %arg1[%c0, %c0_0] : memref<8x8xf32, #tpu.memory_space<vmem>>, vector<8x8xf32>
    %c0_1 = arith.constant 0 : index
    %c0_2 = arith.constant 0 : index
    %1 = vector.load %arg2[%c0_1, %c0_2] : memref<8x128xf32, #tpu.memory_space<vmem>>, vector<8x128xf32>
    %cst = arith.constant dense<0.000000e+00> : vector<8x128xf32>
    %2 = tpu.matmul %0, %1, %cst {dimension_numbers = #tpu.dot_dimension_numbers<[1], [0], [0], [1], [0, 0, 1, 1], [], []>} : vector<8x8xf32>, vector<8x128xf32>, vector<8x128xf32> -> vector<8x128xf32>
    %c0_3 = arith.constant 0 : index
    %c0_4 = arith.constant 0 : index
    %3 = vector.load %arg3[%c0_3, %c0_4] : memref<1x128xf32, #tpu.memory_space<vmem>>, vector<1x128xf32>
    %4 = vector.broadcast %3 : vector<1x128xf32> to vector<8x128xf32>
    %5 = arith.addf %2, %4 : vector<8x128xf32>
    %cst_5 = arith.constant 0.000000e+00 : f32
    %6 = vector.broadcast %cst_5 : f32 to vector<8x128xf32>
    %7 = arith.maximumf %5, %6 : vector<8x128xf32>
    %c0_6 = arith.constant 0 : index
    %c0_7 = arith.constant 0 : index
    %8 = vector.load %arg4[%c0_6, %c0_7] : memref<128x128xf32, #tpu.memory_space<vmem>>, vector<128x128xf32>
    %cst_8 = arith.constant dense<0.000000e+00> : vector<8x128xf32>
    %9 = tpu.matmul %7, %8, %cst_8 {dimension_numbers = #tpu.dot_dimension_numbers<[1], [0], [0], [1], [0, 0, 1, 1], [], []>} : vector<8x128xf32>, vector<128x128xf32>, vector<8x128xf32> -> vector<8x128xf32>
    %c0_9 = arith.constant 0 : index
    %c0_10 = arith.constant 0 : index
    %10 = vector.load %arg5[%c0_9, %c0_10] : memref<1x128xf32, #tpu.memory_space<vmem>>, vector<1x128xf32>
    %11 = vector.broadcast %10 : vector<1x128xf32> to vector<8x128xf32>
    %12 = arith.addf %9, %11 : vector<8x128xf32>
    %cst_11 = arith.constant 0.000000e+00 : f32
    %13 = vector.broadcast %cst_11 : f32 to vector<8x128xf32>
    %14 = arith.maximumf %12, %13 : vector<8x128xf32>
    %c0_12 = arith.constant 0 : index
    %c0_13 = arith.constant 0 : index
    %15 = vector.load %arg6[%c0_12, %c0_13] : memref<128x4xf32, #tpu.memory_space<vmem>>, vector<128x4xf32>
    %cst_14 = arith.constant dense<0.000000e+00> : vector<8x4xf32>
    %16 = tpu.matmul %14, %15, %cst_14 {dimension_numbers = #tpu.dot_dimension_numbers<[1], [0], [0], [1], [0, 0, 1, 1], [], []>} : vector<8x128xf32>, vector<128x4xf32>, vector<8x4xf32> -> vector<8x4xf32>
    %c0_15 = arith.constant 0 : index
    %c0_16 = arith.constant 0 : index
    %17 = vector.load %arg7[%c0_15, %c0_16] : memref<1x4xf32, #tpu.memory_space<vmem>>, vector<1x4xf32>
    %18 = vector.broadcast %17 : vector<1x4xf32> to vector<8x4xf32>
    %19 = arith.addf %16, %18 : vector<8x4xf32>
    %20 = math.tanh %19 : vector<8x4xf32>
    %c0_17 = arith.constant 0 : index
    %c0_18 = arith.constant 0 : index
    %21 = vector.load %arg8[%c0_17, %c0_18] : memref<8x4xf32, #tpu.memory_space<vmem>>, vector<8x4xf32>
    tpu.vector_store %arg8[%c0_17, %c0_18], %20 {strides = array<i32>} : memref<8x4xf32, #tpu.memory_space<vmem>>, vector<8x4xf32>,
    return
  }
  func.func @transform_0(%arg0: i32) -> (i32, i32) {
    %c0_i32 = arith.constant 0 : i32
    %c0_i32_0 = arith.constant 0 : i32
    return %arg0, %c0_i32 : i32, i32
  }
  func.func @transform_1(%arg0: i32) -> (i32, i32) {
    %c0_i32 = arith.constant 0 : i32
    %c0_i32_0 = arith.constant 0 : i32
    %c0_i32_1 = arith.constant 0 : i32
    return %c0_i32, %c0_i32_0 : i32, i32
  }
  func.func @transform_2(%arg0: i32) -> (i32, i32) {
    %c0_i32 = arith.constant 0 : i32
    %c0_i32_0 = arith.constant 0 : i32
    %c0_i32_1 = arith.constant 0 : i32
    return %c0_i32, %c0_i32_0 : i32, i32
  }
  func.func @transform_3(%arg0: i32) -> (i32, i32) {
    %c0_i32 = arith.constant 0 : i32
    %c0_i32_0 = arith.constant 0 : i32
    %c0_i32_1 = arith.constant 0 : i32
    return %c0_i32, %c0_i32_0 : i32, i32
  }
  func.func @transform_4(%arg0: i32) -> (i32, i32) {
    %c0_i32 = arith.constant 0 : i32
    %c0_i32_0 = arith.constant 0 : i32
    %c0_i32_1 = arith.constant 0 : i32
    return %c0_i32, %c0_i32_0 : i32, i32
  }
  func.func @transform_5(%arg0: i32) -> (i32, i32) {
    %c0_i32 = arith.constant 0 : i32
    %c0_i32_0 = arith.constant 0 : i32
    %c0_i32_1 = arith.constant 0 : i32
    return %c0_i32, %c0_i32_0 : i32, i32
  }
  func.func @transform_6(%arg0: i32) -> (i32, i32) {
    %c0_i32 = arith.constant 0 : i32
    %c0_i32_0 = arith.constant 0 : i32
    %c0_i32_1 = arith.constant 0 : i32
    return %c0_i32, %c0_i32_0 : i32, i32
  }
  func.func @transform_7(%arg0: i32) -> (i32, i32) {
    %c0_i32 = arith.constant 0 : i32
    %c0_i32_0 = arith.constant 0 : i32
    return %arg0, %c0_i32 : i32, i32
  }
}

</mosaic_0001>

<bundles_post_ra>
// kernel: actor_forward.1
= control target key start
LH: loop header
LB: loop body
LE: loop exit
PB: predicated region body
PF: predicated region fallthrough
CT: control target
= control target key end

     0   :  { %vm35_vm0 = vcmask 64512   ;;  %v423_v0 = vmov 0.0   ;;  %vm424_vm1 = vmmov 0   ;;  %vm298_vm2 = vcmask 31744   ;;  %s618_s1 = inlined_call_operand.vmem [shape: f32[8,128], index: 1, kind: input, shape index: {}]   ;;  %s619_s0 = inlined_call_operand.vmem [shape: f32[8,8], index: 0, kind: input, shape index: {}]   ;;  %s620_s3 = inlined_call_operand.vmem [shape: f32[128,128], index: 3, kind: input, shape index: {}]   ;;  %s621_s5 = inlined_call_operand.vmem [shape: f32[128,4], index: 5, kind: input, shape index: {}]   ;;  %s622_s2 = inlined_call_operand.vmem [shape: f32[1,128], index: 2, kind: input, shape index: {}]   ;;  %s623_s4 = inlined_call_operand.vmem [shape: f32[1,128], index: 4, kind: input, shape index: {}]   ;;  %s624_s6 = inlined_call_operand.vmem [shape: f32[1,4], index: 6, kind: input, shape index: {}]   ;;  %s625_s7 = inlined_call_operand.vmem [shape: f32[8,4], index: 7, kind: output, shape index: {}]  }
   0x1   :  { %344 = vmatprep.subr.mxu0 %v423_v0  ;;  %v27_v1 = vld [vmem:[%s618_s1] sm:$0xff]  ;;  %346 = vmatprep.mubr.msk.f32.mxu0 %vm424_vm1, %v423_v0  ;;  %v125_v3 = vld [vmem:[%s620_s3 + $0x78] sm:$0xff]  ;;  %v124_v4 = vld [vmem:[%s620_s3 + $0x70] sm:$0xff] }
   0x2   :  { %v26_v2 = vld [vmem:[%s619_s0] sm:$0xff]  ;;  %345 = vmatpush3.msra.mxu0 %v27_v1  ;;  %349 = vmatprep.subr.mxu1 %v423_v0  ;;  %v123_v5 = vld [vmem:[%s620_s3 + $0x68] sm:$0xff]  ;;  %v121_v7 = vld [vmem:[%s620_s3 + $0x58] sm:$0xff] }
   0x3   :  { %347 = vmatmul.mubr.msk.f32.vlgmr.msra.gmra.mxu0 %vm35_vm0, %v26_v2  ;;  %350 = vmatpush3.msra.mxu1 %v125_v3  ;;  %v122_v6 = vld [vmem:[%s620_s3 + $0x60] sm:$0xff]  ;;  %v120_v8 = vld [vmem:[%s620_s3 + $0x50] sm:$0xff]  ;;  %v119_v9 = vld [vmem:[%s620_s3 + $0x48] sm:$0xff] }
   0x4   :  { %351 = vmatprep.subr.mxu1 %v423_v0  ;;  %381 = vmatprep.mubr.msk.f32.mxu1 %vm424_vm1, %v423_v0  ;;  %v118_v10 = vld [vmem:[%s620_s3 + $0x40] sm:$0xff]  ;;  %v117_v11 = vld [vmem:[%s620_s3 + $0x38] sm:$0xff]  ;;  %v116_v12 = vld [vmem:[%s620_s3 + $0x30] sm:$0xff] }
   0x5   :  { %352 = vmatpush3.msra.mxu1 %v124_v4  ;;  %384 = vmatprep.subr.mxu0 %v423_v0  ;;  %v115_v13 = vld [vmem:[%s620_s3 + $0x28] sm:$0xff]  ;;  %v114_v14 = vld [vmem:[%s620_s3 + $0x20] sm:$0xff]  ;;  %v113_v15 = vld [vmem:[%s620_s3 + $0x18] sm:$0xff] }
   0x6   :  { %353 = vmatprep.subr.mxu1 %v423_v0  ;;  %416 = vmatprep.mubr.msk.f32.mxu0 %vm424_vm1, %v423_v0  ;;  %v112_v16 = vld [vmem:[%s620_s3 + $0x10] sm:$0xff]  ;;  %v111_v17 = vld [vmem:[%s620_s3 + $0x8] sm:$0xff]  ;;  %v110_v18 = vld [vmem:[%s620_s3] sm:$0xff] }
   0x7   :  { %354 = vmatpush3.msra.mxu1 %v123_v5  ;;  %v219_v19 = vld [vmem:[%s621_s5 + $0x78] sm:$0xff]  ;;  %v218_v20 = vld [vmem:[%s621_s5 + $0x70] sm:$0xff]  ;;  %v217_v21 = vld [vmem:[%s621_s5 + $0x68] sm:$0xff] }
   0x8   :  { %355 = vmatprep.subr.mxu1 %v423_v0  ;;  %385 = vmatpush3.msra.mxu0 %v219_v19  ;;  %v216_v22 = vld [vmem:[%s621_s5 + $0x60] sm:$0xff]  ;;  %v215_v23 = vld [vmem:[%s621_s5 + $0x58] sm:$0xff]  ;;  %v214_v24 = vld [vmem:[%s621_s5 + $0x50] sm:$0xff] }
   0x9   :  { %356 = vmatpush3.msra.mxu1 %v122_v6  ;;  %386 = vmatprep.subr.mxu0 %v423_v0  ;;  %v213_v25 = vld [vmem:[%s621_s5 + $0x48] sm:$0xff]  ;;  %v212_v26 = vld [vmem:[%s621_s5 + $0x40] sm:$0xff]  ;;  %v211_v27 = vld [vmem:[%s621_s5 + $0x38] sm:$0xff] }
   0xa   :  { %357 = vmatprep.subr.mxu1 %v423_v0  ;;  %387 = vmatpush3.msra.mxu0 %v218_v20  ;;  %v210_v28 = vld [vmem:[%s621_s5 + $0x30] sm:$0xff]  ;;  %v209_v29 = vld [vmem:[%s621_s5 + $0x28] sm:$0xff]  ;;  %v208_v30 = vld [vmem:[%s621_s5 + $0x20] sm:$0xff] }
   0xb   :  { %358 = vmatpush3.msra.mxu1 %v121_v7  ;;  %388 = vmatprep.subr.mxu0 %v423_v0  ;;  %v207_v31 = vld [vmem:[%s621_s5 + $0x18] sm:$0xff]  ;;  %v304_v32 = vld [vmem:[%s622_s2] ss:$0 sm:$0xff]  ;;  %v206_v37 = vld [vmem:[%s621_s5 + $0x10] sm:$0xff] }
   0xc   :  { %359 = vmatprep.subr.mxu1 %v423_v0  ;;  %389 = vmatpush3.msra.mxu0 %v217_v21  ;;  %v205_v38 = vld [vmem:[%s621_s5 + $0x8] sm:$0xff]  ;;  %v204_v39 = vld [vmem:[%s621_s5] sm:$0xff] }
   0xd   :  { %360 = vmatpush3.msra.mxu1 %v120_v8  ;;  %390 = vmatprep.subr.mxu0 %v423_v0  ;;  %v306_v40 = vld [vmem:[%s623_s4] ss:$0 sm:$0xff] }
   0xe   :  { %361 = vmatprep.subr.mxu1 %v423_v0  ;;  %391 = vmatpush3.msra.mxu0 %v216_v22  ;;  %v307_v45 = vld [vmem:[%s624_s6] ss:$0 sm:$0xff] }
   0xf   :  { %362 = vmatpush3.msra.mxu1 %v119_v9  ;;  %392 = vmatprep.subr.mxu0 %v423_v0 }
  0x10   :  { %363 = vmatprep.subr.mxu1 %v423_v0  ;;  %393 = vmatpush3.msra.mxu0 %v215_v23 }
  0x11   :  { %364 = vmatpush3.msra.mxu1 %v118_v10  ;;  %394 = vmatprep.subr.mxu0 %v423_v0 }
  0x12   :  { %365 = vmatprep.subr.mxu1 %v423_v0  ;;  %395 = vmatpush3.msra.mxu0 %v214_v24 }
  0x13   :  { %366 = vmatpush3.msra.mxu1 %v117_v11  ;;  %396 = vmatprep.subr.mxu0 %v423_v0 }
  0x14   :  { %367 = vmatprep.subr.mxu1 %v423_v0  ;;  %397 = vmatpush3.msra.mxu0 %v213_v25 }
  0x15   :  { %368 = vmatpush3.msra.mxu1 %v116_v12  ;;  %398 = vmatprep.subr.mxu0 %v423_v0 }
  0x16   :  { %369 = vmatprep.subr.mxu1 %v423_v0  ;;  %399 = vmatpush3.msra.mxu0 %v212_v26 }
  0x17   :  { %370 = vmatpush3.msra.mxu1 %v115_v13  ;;  %400 = vmatprep.subr.mxu0 %v423_v0 }
  0x18   :  { %371 = vmatprep.subr.mxu1 %v423_v0  ;;  %401 = vmatpush3.msra.mxu0 %v211_v27 }
  0x19   :  { %372 = vmatpush3.msra.mxu1 %v114_v14  ;;  %402 = vmatprep.subr.mxu0 %v423_v0 }
  0x1a   :  { %373 = vmatprep.subr.mxu1 %v423_v0  ;;  %403 = vmatpush3.msra.mxu0 %v210_v28 }
  0x1b   :  { %374 = vmatpush3.msra.mxu1 %v113_v15  ;;  %404 = vmatprep.subr.mxu0 %v423_v0 }
  0x1c   :  { %375 = vmatprep.subr.mxu1 %v423_v0  ;;  %405 = vmatpush3.msra.mxu0 %v209_v29 }
  0x1d   :  { %376 = vmatpush3.msra.mxu1 %v112_v16  ;;  %406 = vmatprep.subr.mxu0 %v423_v0 }
  0x1e   :  { %377 = vmatprep.subr.mxu1 %v423_v0  ;;  %407 = vmatpush3.msra.mxu0 %v208_v30 }
  0x1f   :  { %378 = vmatpush3.msra.mxu1 %v111_v17  ;;  %408 = vmatprep.subr.mxu0 %v423_v0 }
  0x20   :  { %379 = vmatprep.subr.mxu1 %v423_v0  ;;  %409 = vmatpush3.msra.mxu0 %v207_v31 }
  0x21   :  { %380 = vmatpush3.msra.mxu1 %v110_v18  ;;  %410 = vmatprep.subr.mxu0 %v423_v0 }
  0x22   :  { %411 = vmatpush3.msra.mxu0 %v206_v37 }
  0x23   :  { %412 = vmatprep.subr.mxu0 %v423_v0 }
  0x24   :  { %413 = vmatpush3.msra.mxu0 %v205_v38 }
  0x25   :  { %414 = vmatprep.subr.mxu0 %v423_v0 }
  0x26   :  { %415 = vmatpush3.msra.mxu0 %v204_v39 }
  0xc3   :  { %v105_v33 = vpop.f32.mrf.mxu0 }
  0xc4   :  { %v106_v34 = vadd.f32 %v304_v32, %v105_v33 }
  0xc5   :  { %v348_v35 = vpop.f32.mrf.mxu0 }
  0xc6   :  { %v109_v36 = vmax.f32 %v106_v34, 0.0 }
  0xc8   :  { %382 = vmatmul.mubr.f32.vlgmr.msra.gmra.mxu1 %v109_v36 }
 0x188   :  { %v199_v41 = vpop.f32.mrf.mxu1 }
 0x189   :  { %v200_v42 = vadd.f32 %v306_v40, %v199_v41 }
 0x18a   :  { %v383_v43 = vpop.f32.mrf.mxu1 }
 0x18b   :  { %v203_v44 = vmax.f32 %v200_v42, 0.0 }
 0x18d   :  { %417 = vmatmul.mubr.f32.vlgmr.msra.gmra.mxu0 %v203_v44 }
 0x24d   :  { %v293_v46 = vpop.f32.mrf.mxu0 }
 0x24e   :  { %v294_v47 = vadd.f32 %v307_v45, %v293_v46 }
 0x24f   :  { %v418_v48 = vpop.f32.mrf.mxu0 }
 0x250   :  { %421 = vtanh.f32 %v294_v47 }
 0x25d   :  { %v422_v49 = vpop.eup %421 }
 0x25e   :  { %299 = vst.msk [vmem:[%s625_s7] sm:$0xff] %vm298_vm2, %v422_v49 }

</bundles_post_ra>
